<compile_context>
chip_gen: v7x
topology: tpu7x:2x2x1
jax: 0.10.0
libtpu: 0.0.40
codegen_flags: <defaults>
</compile_context>

<pallas_src>
import functools

import jax
import jax.numpy as jnp
from jax import lax
from jax.experimental import pallas as pl
from jax.experimental.pallas import tpu as pltpu


# --------------------------------------------------------------------------- #
# Helpers: padding / tile selection / VMEM budgeting
# --------------------------------------------------------------------------- #
def _round_up(x, m):
    return (x + m - 1) // m * m


def _vmem_capacity_bytes():
    try:
        return int(pltpu.get_tpu_info().vmem_capacity_bytes)
    except Exception:
        return 64 * 1024 * 1024   # v7x-safe fallback


def _pick_tile_v(V, H_pad, requested=None, budget_bytes=None, max_batch=64):
    """Largest vocab tile (multiple of 128, dividing V) whose streamed footprint
    fits the VMEM budget."""
    if requested is not None:
        assert V % requested == 0, "vocab must be divisible by tile_v"
        return requested
    if budget_bytes is None:
        budget_bytes = int(0.45 * _vmem_capacity_bytes())

    def footprint(tv):
        return (2 * H_pad * tv * 2        # w_out tile, double-buffered, bf16
                + 2 * tv * 4              # b_out tile
                + 2 * max_batch * tv * 4  # gumbel tile
                + 2 * max_batch * tv * 4)  # logits out tile

    cands = [t for t in range(8192, 0, -128) if t <= V and V % t == 0]
    if not cands:
        cands = [V]                        # tiny / odd vocab: one full-width tile
    for tv in cands:
        if footprint(tv) <= budget_bytes:
            return tv
    return cands[-1]


def _vmem_limit_bytes(B, H_pad, TV):
    cap = _vmem_capacity_bytes()
    fp = (2 * H_pad * TV * 2 + 2 * TV * 4 + 2 * B * TV * 4 + 2 * B * TV * 4
          + 2 * B * H_pad * 2 + 8 * B * 128 * 4)
    limit = int(fp * 1.5) + (8 << 20)
    return max(16 << 20, min(limit, int(0.75 * cap)))


# --------------------------------------------------------------------------- #
# Kernel 1: GRU cell (single invocation, two fused gate matmuls)
# --------------------------------------------------------------------------- #
def _gru_cell_kernel(x_ref, h_ref, wih_ref, bih_ref, whh_ref, bhh_ref,
                     h_out_ref, h_bf_ref):
    Hp = h_ref.shape[1]
    xb = x_ref[...].astype(jnp.bfloat16)
    hb = h_ref[...].astype(jnp.bfloat16)

    # Two wide matmuls (N = 3*H_pad) instead of six narrow ones.
    gi = jnp.dot(xb, wih_ref[...], preferred_element_type=jnp.float32) + bih_ref[...]
    gh = jnp.dot(hb, whh_ref[...], preferred_element_type=jnp.float32) + bhh_ref[...]

    # Lane-aligned slices (H_pad is a multiple of 128).
    i_r, i_z, i_n = gi[:, :Hp], gi[:, Hp:2 * Hp], gi[:, 2 * Hp:]
    h_r, h_z, h_n = gh[:, :Hp], gh[:, Hp:2 * Hp], gh[:, 2 * Hp:]

    r = jax.nn.sigmoid(i_r + h_r)
    z = jax.nn.sigmoid(i_z + h_z)
    n = jnp.tanh(i_n + r * h_n)
    h_new = (1.0 - z) * n + z * h_ref[...]        # combine stays f32

    h_out_ref[...] = h_new
    h_bf_ref[...] = h_new.astype(jnp.bfloat16)    # bf16 copy for the vocab matmul


# --------------------------------------------------------------------------- #
# Kernel 2: streamed vocab projection + online softmax stats + Gumbel-argmax
# --------------------------------------------------------------------------- #
def _vocab_sample_kernel(h_ref, wout_ref, bout_ref, gumbel_ref,
                         sample_ref, logits_ref, m_ref, denom_ref,
                         m_run, s_run, best_s, best_i):
    j = pl.program_id(0)
    nj = pl.num_programs(0)

    @pl.when(j == 0)
    def _():
        m_run[...] = jnp.full(m_run.shape, -jnp.inf, jnp.float32)
        s_run[...] = jnp.zeros(s_run.shape, jnp.float32)
        best_s[...] = jnp.full(best_s.shape, -jnp.inf, jnp.float32)
        best_i[...] = jnp.zeros(best_i.shape, jnp.int32)

    # One contiguous (H_pad, TV) tile of the output weight per grid step.
    logits = jnp.dot(h_ref[...], wout_ref[0],
                     preferred_element_type=jnp.float32) + bout_ref[...]
    logits_ref[...] = logits

    # Online softmax statistics (running max + rescaled running sum-exp).
    tile_max = jnp.max(logits, axis=1, keepdims=True)
    m_new = jnp.maximum(m_run[...], tile_max)
    s_run[...] = s_run[...] * jnp.exp(m_run[...] - m_new) + jnp.sum(
        jnp.exp(logits - m_new), axis=1, keepdims=True)
    m_run[...] = m_new

    # multinomial(softmax(logits), 1) == argmax(logits + gumbel) (shift-invariant).
    scores = logits + gumbel_ref[...]
    B, TV = scores.shape
    tile_best = jnp.max(scores, axis=1, keepdims=True)
    lane_ids = lax.broadcasted_iota(jnp.int32, (B, TV), 1)
    tile_idx = jnp.min(jnp.where(scores >= tile_best, lane_ids, TV),
                       axis=1, keepdims=True) + j * TV
    take = tile_best > best_s[...]
    best_i[...] = jnp.where(take, tile_idx, best_i[...])
    best_s[...] = jnp.where(take, tile_best, best_s[...])

    @pl.when(j == nj - 1)
    def _():
        sample_ref[...] = best_i[...]
        m_ref[...] = m_run[...]
        denom_ref[...] = s_run[...]


# --------------------------------------------------------------------------- #
# Kernel 3: normalize streamed logits into probs (in-place over the logits buffer)
# --------------------------------------------------------------------------- #
def _softmax_finalize_kernel(logits_ref, m_ref, denom_ref, probs_ref):
    inv = pl.reciprocal(denom_ref[...], approx=False)
    probs_ref[...] = jnp.exp(logits_ref[...] - m_ref[...]) * inv


# --------------------------------------------------------------------------- #
# Forward pass
# --------------------------------------------------------------------------- #
@functools.partial(jax.jit, static_argnames=("E_pad", "H_pad", "H"))
def _forward(x, h_last, rng_key, w_ih, b_ih, w_hh, b_hh, w_out_blk, b_out,
             *, E_pad, H_pad, H):
    B, E = x.shape
    nV, _, TV = w_out_blk.shape
    V = nV * TV

    x_pad = jnp.pad(x, ((0, 0), (0, E_pad - E)))
    h_pad = jnp.pad(h_last, ((0, 0), (0, H_pad - H)))
    # Fresh Gumbel noise per call (re-using a seed across decode steps would
    # correlate samples).
    gumbel = jax.random.gumbel(rng_key, (B, V), jnp.float32)

    # ---- GRU cell: single invocation, weights live in VMEM only for this call ----
    h_new_pad, h_bf = pl.pallas_call(
        _gru_cell_kernel,
        out_shape=(jax.ShapeDtypeStruct((B, H_pad), jnp.float32),
                   jax.ShapeDtypeStruct((B, H_pad), jnp.bfloat16)),
        in_specs=[pl.BlockSpec(memory_space=pltpu.MemorySpace.VMEM)] * 6,
        out_specs=(pl.BlockSpec(memory_space=pltpu.MemorySpace.VMEM),) * 2,
    )(x_pad, h_pad, w_ih, b_ih, w_hh, b_hh)

    # ---- Vocab projection + online softmax + Gumbel-argmax, tiled over V ----
    sample2d, logits, m, denom = pl.pallas_call(
        _vocab_sample_kernel,
        out_shape=(
            jax.ShapeDtypeStruct((B, 1), jnp.int32),     # sample
            jax.ShapeDtypeStruct((B, V), jnp.float32),   # logits
            jax.ShapeDtypeStruct((B, 1), jnp.float32),   # softmax max
            jax.ShapeDtypeStruct((B, 1), jnp.float32),   # softmax denom
        ),
        grid_spec=pltpu.PrefetchScalarGridSpec(
            num_scalar_prefetch=0,
            grid=(nV,),
            in_specs=[
                pl.BlockSpec((B, H_pad), lambda j: (0, 0)),          # h (resident)
                pl.BlockSpec((1, H_pad, TV), lambda j: (j, 0, 0)),   # w_out (contiguous tile)
                pl.BlockSpec((1, TV), lambda j: (0, j)),             # b_out tile
                pl.BlockSpec((B, TV), lambda j: (0, j)),             # gumbel tile
            ],
            out_specs=(
                pl.BlockSpec((B, 1), lambda j: (0, 0)),
                pl.BlockSpec((B, TV), lambda j: (0, j)),
                pl.BlockSpec((B, 1), lambda j: (0, 0)),
                pl.BlockSpec((B, 1), lambda j: (0, 0)),
            ),
            scratch_shapes=[
                pltpu.VMEM((B, 1), jnp.float32),   # running max
                pltpu.VMEM((B, 1), jnp.float32),   # running sum-exp
                pltpu.VMEM((B, 1), jnp.float32),   # running best gumbel score
                pltpu.VMEM((B, 1), jnp.int32),     # running best index
            ],
        ),
        compiler_params=pltpu.CompilerParams(
            dimension_semantics=("arbitrary",),
            vmem_limit_bytes=_vmem_limit_bytes(B, H_pad, TV),
        ),
    )(h_bf, w_out_blk, b_out, gumbel)

    # ---- Finalize softmax in place over the logits buffer ----
    probs = pl.pallas_call(
        _softmax_finalize_kernel,
        out_shape=jax.ShapeDtypeStruct((B, V), jnp.float32),
        grid_spec=pltpu.PrefetchScalarGridSpec(
            num_scalar_prefetch=0,
            grid=(nV,),
            in_specs=[
                pl.BlockSpec((B, TV), lambda j: (0, j)),
                pl.BlockSpec((B, 1), lambda j: (0, 0)),
                pl.BlockSpec((B, 1), lambda j: (0, 0)),
            ],
            out_specs=pl.BlockSpec((B, TV), lambda j: (0, j)),
        ),
        input_output_aliases={0: 0},   # probs overwrite the logits buffer
        compiler_params=pltpu.CompilerParams(
            dimension_semantics=("parallel",)),
    )(logits, m, denom)

    sample = jnp.squeeze(sample2d, axis=1)   # torch.squeeze -> (B,)
    h_new = h_new_pad[:, :H]
    return sample, h_new, probs


def generator_forward(prep, x, h_last, rng_key):
    """Returns (sample, h, output) matching Generator.forward."""
    return _forward(x, h_last, rng_key,
                    prep["w_ih"], prep["b_ih"], prep["w_hh"], prep["b_hh"],
                    prep["w_out_blk"], prep["b_out"],
                    E_pad=prep["E_pad"], H_pad=prep["H_pad"], H=prep["H"])


# --------------------------------------------------------------------------- #
# Parameters
# --------------------------------------------------------------------------- #
def init_params(key, vocab_size, embedding_size, hidden_size):
    """Deterministic synthetic params with PyTorch GRUCell/Linear shapes (f32)."""
    ks = jax.random.split(key, 6)
    k = 1.0 / jnp.sqrt(hidden_size)
    u = lambda kk, shape: jax.random.uniform(kk, shape, jnp.float32, -k, k)
    return {
        "w_ih": u(ks[0], (3 * hidden_size, embedding_size)),
        "w_hh": u(ks[1], (3 * hidden_size, hidden_size)),
        "b_ih": u(ks[2], (3 * hidden_size,)),
        "b_hh": u(ks[3], (3 * hidden_size,)),
        "w_out": u(ks[4], (vocab_size, hidden_size)),
        "b_out": u(ks[5], (vocab_size,)),
    }


def prepare_params(params, tile_v=None, vmem_budget_bytes=None):
    """One-time conversion to the kernel layout (NOT per forward):
    - E and H padded to multiples of 128 (lane-aligned gate slices, no Mosaic padding),
    - GRU gate weights fused into (in_pad, 3*H_pad) bf16 (two wide matmuls),
    - output weight pre-blocked into (nV, H_pad, TILE_V) bf16 contiguous vocab tiles,
    - biases stay f32."""
    H = params["w_hh"].shape[1]
    E = params["w_ih"].shape[1]
    V = params["w_out"].shape[0]
    E_pad = _round_up(E, 128)
    H_pad = _round_up(H, 128)
    TV = _pick_tile_v(V, H_pad, tile_v, vmem_budget_bytes)
    nV = V // TV

    def fuse_gates(w, in_dim, in_pad):
        w3 = w.reshape(3, H, in_dim)                      # [r, z, n], each (H, in)
        w3 = jnp.transpose(w3, (0, 2, 1))                 # (3, in, H)
        w3 = jnp.pad(w3, ((0, 0), (0, in_pad - in_dim), (0, H_pad - H)))
        return jnp.transpose(w3, (1, 0, 2)).reshape(in_pad, 3 * H_pad).astype(jnp.bfloat16)

    def fuse_bias(b):
        b3 = jnp.pad(b.reshape(3, H), ((0, 0), (0, H_pad - H)))
        return b3.reshape(1, 3 * H_pad).astype(jnp.float32)

    w_out_t = jnp.pad(params["w_out"].T, ((0, H_pad - H), (0, 0)))      # (H_pad, V)
    w_out_blk = jnp.transpose(w_out_t.reshape(H_pad, nV, TV), (1, 0, 2)).astype(jnp.bfloat16)

    return {
        "w_ih": fuse_gates(params["w_ih"], E, E_pad),
        "b_ih": fuse_bias(params["b_ih"]),
        "w_hh": fuse_gates(params["w_hh"], H, H_pad),
        "b_hh": fuse_bias(params["b_hh"]),
        "w_out_blk": w_out_blk,
        "b_out": params["b_out"].reshape(1, V).astype(jnp.float32),
        "E": E, "H": H, "V": V, "E_pad": E_pad, "H_pad": H_pad, "tile_v": TV,
    }


def _reference(params, x, h):
    """Pure-JAX f32 reference of the deterministic part of the forward pass."""
    H = params["w_hh"].shape[1]
    gi = x @ params["w_ih"].T + params["b_ih"]
    gh = h @ params["w_hh"].T + params["b_hh"]
    i_r, i_z, i_n = gi[:, :H], gi[:, H:2 * H], gi[:, 2 * H:]
    h_r, h_z, h_n = gh[:, :H], gh[:, H:2 * H], gh[:, 2 * H:]
    r = jax.nn.sigmoid(i_r + h_r)
    z = jax.nn.sigmoid(i_z + h_z)
    n = jnp.tanh(i_n + r * h_n)
    h_new = (1.0 - z) * n + z * h
    logits = h_new @ params["w_out"].T + params["b_out"]
    probs = jax.nn.softmax(logits, axis=1)
    return h_new, probs


if __name__ == "__main__":
    VOCAB, EMB, HID, BATCH = 256, 16, 32, 8
    TILE_V = 128   # -> grid=(2,): exercises the streamed-vocab / online-softmax path

    key = jax.random.PRNGKey(0)
    k_p, k_x, k_h, k_s = jax.random.split(key, 4)

    params = init_params(k_p, VOCAB, EMB, HID)
    prep = prepare_params(params, tile_v=TILE_V)   # one-time layout/bf16 conversion

    x = jax.random.normal(k_x, (BATCH, EMB), jnp.float32)
    h_last = jax.random.normal(k_h, (BATCH, HID), jnp.float32)

    sample, h, output = generator_forward(prep, x, h_last, k_s)
    jax.block_until_ready((sample, h, output))

    # Shape / dtype / range checks (multinomial is stochastic -> range only).
    assert sample.shape == (BATCH,) and sample.dtype == jnp.int32
    assert h.shape == (BATCH, HID)
    assert output.shape == (BATCH, VOCAB)
    assert bool(jnp.all((sample >= 0) & (sample < VOCAB)))
    # softmax rows sum to 1
    assert jnp.allclose(jnp.sum(output, axis=1), 1.0, atol=2e-3)

    # Numerics vs. an f32 reference (bf16 MXU operands -> generous tolerance).
    h_ref, probs_ref = _reference(params, x, h_last)
    assert jnp.allclose(h, h_ref, rtol=5e-2, atol=2e-2)
    assert jnp.allclose(output, probs_ref, rtol=5e-2, atol=2e-3)

    print("KERNEL_OK")
</pallas_src>

<mosaic_0001>
module attributes {stable_mosaic.version = 11 : i64} {
  func.func @_softmax_finalize_kernel(%arg0: i32, %arg1: memref<8x128xf32, #tpu.memory_space<vmem>>, %arg2: memref<8x1xf32, #tpu.memory_space<vmem>>, %arg3: memref<8x1xf32, #tpu.memory_space<vmem>>, %arg4: memref<8x128xf32, #tpu.memory_space<vmem>>) attributes {dimension_semantics = [#tpu.dimension_semantics<parallel>], iteration_bounds = array<i64: 2>, scalar_prefetch = 0 : i64, scratch_operands = 0 : i64, tpu.core_type = #tpu.core_type<tc>, window_params = [{transform_indices = @transform_0, window_bounds = array<i64: 8, 128>}, {pipeline_mode = #tpu.pipeline_mode<synchronous>, transform_indices = @transform_1, window_bounds = array<i64: 8, 1>}, {pipeline_mode = #tpu.pipeline_mode<synchronous>, transform_indices = @transform_2, window_bounds = array<i64: 8, 1>}, {transform_indices = @transform_3, window_bounds = array<i64: 8, 128>}]} {
    %c0 = arith.constant 0 : index
    %c0_0 = arith.constant 0 : index
    %0 = vector.load %arg3[%c0, %c0_0] : memref<8x1xf32, #tpu.memory_space<vmem>>, vector<8x1xf32>
    %1 = tpu.reciprocal %0 : vector<8x1xf32> -> vector<8x1xf32>
    %c0_1 = arith.constant 0 : index
    %c0_2 = arith.constant 0 : index
    %2 = vector.load %arg1[%c0_1, %c0_2] : memref<8x128xf32, #tpu.memory_space<vmem>>, vector<8x128xf32>
    %c0_3 = arith.constant 0 : index
    %c0_4 = arith.constant 0 : index
    %3 = vector.load %arg2[%c0_3, %c0_4] : memref<8x1xf32, #tpu.memory_space<vmem>>, vector<8x1xf32>
    %4 = vector.broadcast %3 : vector<8x1xf32> to vector<8x128xf32>
    %5 = arith.subf %2, %4 : vector<8x128xf32>
    %6 = math.exp %5 : vector<8x128xf32>
    %7 = vector.broadcast %1 : vector<8x1xf32> to vector<8x128xf32>
    %8 = arith.mulf %6, %7 : vector<8x128xf32>
    %c0_5 = arith.constant 0 : index
    %c0_6 = arith.constant 0 : index
    %9 = vector.load %arg4[%c0_5, %c0_6] : memref<8x128xf32, #tpu.memory_space<vmem>>, vector<8x128xf32>
    tpu.vector_store %arg4[%c0_5, %c0_6], %8 {strides = array<i32>} : memref<8x128xf32, #tpu.memory_space<vmem>>, vector<8x128xf32>,
    return
  }
  func.func @transform_0(%arg0: i32) -> (i32, i32) {
    %c0_i32 = arith.constant 0 : i32
    %c0_i32_0 = arith.constant 0 : i32
    return %c0_i32, %arg0 : i32, i32
  }
  func.func @transform_1(%arg0: i32) -> (i32, i32) {
    %c0_i32 = arith.constant 0 : i32
    %c0_i32_0 = arith.constant 0 : i32
    %c0_i32_1 = arith.constant 0 : i32
    return %c0_i32, %c0_i32_0 : i32, i32
  }
  func.func @transform_2(%arg0: i32) -> (i32, i32) {
    %c0_i32 = arith.constant 0 : i32
    %c0_i32_0 = arith.constant 0 : i32
    %c0_i32_1 = arith.constant 0 : i32
    return %c0_i32, %c0_i32_0 : i32, i32
  }
  func.func @transform_3(%arg0: i32) -> (i32, i32) {
    %c0_i32 = arith.constant 0 : i32
    %c0_i32_0 = arith.constant 0 : i32
    return %c0_i32, %arg0 : i32, i32
  }
}

module attributes {stable_mosaic.version = 11 : i64} {
  func.func @_gru_cell_kernel(%arg0: memref<8x128xf32, #tpu.memory_space<vmem>>, %arg1: memref<8x128xf32, #tpu.memory_space<vmem>>, %arg2: memref<128x384xbf16, #tpu.memory_space<vmem>>, %arg3: memref<1x384xf32, #tpu.memory_space<vmem>>, %arg4: memref<128x384xbf16, #tpu.memory_space<vmem>>, %arg5: memref<1x384xf32, #tpu.memory_space<vmem>>, %arg6: memref<8x128xf32, #tpu.memory_space<vmem>>, %arg7: memref<8x128xbf16, #tpu.memory_space<vmem>>) attributes {dimension_semantics = [], scalar_prefetch = 0 : i64, scratch_operands = 0 : i64, tpu.core_type = #tpu.core_type<tc>} {
    %c0 = arith.constant 0 : index
    %c0_0 = arith.constant 0 : index
    %0 = vector.load %arg0[%c0, %c0_0] : memref<8x128xf32, #tpu.memory_space<vmem>>, vector<8x128xf32>
    %1 = arith.truncf %0 : vector<8x128xf32> to vector<8x128xbf16>
    %c0_1 = arith.constant 0 : index
    %c0_2 = arith.constant 0 : index
    %2 = vector.load %arg1[%c0_1, %c0_2] : memref<8x128xf32, #tpu.memory_space<vmem>>, vector<8x128xf32>
    %3 = arith.truncf %2 : vector<8x128xf32> to vector<8x128xbf16>
    %c0_3 = arith.constant 0 : index
    %c0_4 = arith.constant 0 : index
    %4 = vector.load %arg2[%c0_3, %c0_4] : memref<128x384xbf16, #tpu.memory_space<vmem>>, vector<128x384xbf16>
    %cst = arith.constant dense<0.000000e+00> : vector<8x384xf32>
    %5 = tpu.matmul %1, %4, %cst {dimension_numbers = #tpu.dot_dimension_numbers<[1], [0], [0], [1], [0, 0, 1, 1], [], []>} : vector<8x128xbf16>, vector<128x384xbf16>, vector<8x384xf32> -> vector<8x384xf32>
    %c0_5 = arith.constant 0 : index
    %c0_6 = arith.constant 0 : index
    %6 = vector.load %arg3[%c0_5, %c0_6] : memref<1x384xf32, #tpu.memory_space<vmem>>, vector<1x384xf32>
    %7 = vector.broadcast %6 : vector<1x384xf32> to vector<8x384xf32>
    %8 = arith.addf %5, %7 : vector<8x384xf32>
    %c0_7 = arith.constant 0 : index
    %c0_8 = arith.constant 0 : index
    %9 = vector.load %arg4[%c0_7, %c0_8] : memref<128x384xbf16, #tpu.memory_space<vmem>>, vector<128x384xbf16>
    %cst_9 = arith.constant dense<0.000000e+00> : vector<8x384xf32>
    %10 = tpu.matmul %3, %9, %cst_9 {dimension_numbers = #tpu.dot_dimension_numbers<[1], [0], [0], [1], [0, 0, 1, 1], [], []>} : vector<8x128xbf16>, vector<128x384xbf16>, vector<8x384xf32> -> vector<8x384xf32>
    %c0_10 = arith.constant 0 : index
    %c0_11 = arith.constant 0 : index
    %11 = vector.load %arg5[%c0_10, %c0_11] : memref<1x384xf32, #tpu.memory_space<vmem>>, vector<1x384xf32>
    %12 = vector.broadcast %11 : vector<1x384xf32> to vector<8x384xf32>
    %13 = arith.addf %10, %12 : vector<8x384xf32>
    %14 = vector.extract_strided_slice %8 {offsets = [0, 0], sizes = [8, 128], strides = [1, 1]} : vector<8x384xf32> to vector<8x128xf32>
    %15 = vector.extract_strided_slice %8 {offsets = [0, 128], sizes = [8, 128], strides = [1, 1]} : vector<8x384xf32> to vector<8x128xf32>
    %16 = vector.extract_strided_slice %8 {offsets = [0, 256], sizes = [8, 128], strides = [1, 1]} : vector<8x384xf32> to vector<8x128xf32>
    %17 = vector.extract_strided_slice %13 {offsets = [0, 0], sizes = [8, 128], strides = [1, 1]} : vector<8x384xf32> to vector<8x128xf32>
    %18 = vector.extract_strided_slice %13 {offsets = [0, 128], sizes = [8, 128], strides = [1, 1]} : vector<8x384xf32> to vector<8x128xf32>
    %19 = vector.extract_strided_slice %13 {offsets = [0, 256], sizes = [8, 128], strides = [1, 1]} : vector<8x384xf32> to vector<8x128xf32>
    %20 = arith.addf %14, %17 : vector<8x128xf32>
    %21 = arith.negf %20 : vector<8x128xf32>
    %22 = math.exp %21 : vector<8x128xf32>
    %cst_12 = arith.constant 1.000000e+00 : f32
    %23 = vector.broadcast %cst_12 : f32 to vector<8x128xf32>
    %24 = arith.addf %23, %22 : vector<8x128xf32>
    %25 = arith.divf %23, %24 : vector<8x128xf32>
    %26 = arith.addf %15, %18 : vector<8x128xf32>
    %27 = arith.negf %26 : vector<8x128xf32>
    %28 = math.exp %27 : vector<8x128xf32>
    %cst_13 = arith.constant 1.000000e+00 : f32
    %29 = vector.broadcast %cst_13 : f32 to vector<8x128xf32>
    %30 = arith.addf %29, %28 : vector<8x128xf32>
    %31 = arith.divf %29, %30 : vector<8x128xf32>
    %32 = arith.mulf %25, %19 : vector<8x128xf32>
    %33 = arith.addf %16, %32 : vector<8x128xf32>
    %34 = math.tanh %33 : vector<8x128xf32>
    %cst_14 = arith.constant 1.000000e+00 : f32
    %35 = vector.broadcast %cst_14 : f32 to vector<8x128xf32>
    %36 = arith.subf %35, %31 : vector<8x128xf32>
    %37 = arith.mulf %36, %34 : vector<8x128xf32>
    %c0_15 = arith.constant 0 : index
    %c0_16 = arith.constant 0 : index
    %38 = vector.load %arg1[%c0_15, %c0_16] : memref<8x128xf32, #tpu.memory_space<vmem>>, vector<8x128xf32>
    %39 = arith.mulf %31, %38 : vector<8x128xf32>
    %40 = arith.addf %37, %39 : vector<8x128xf32>
    %c0_17 = arith.constant 0 : index
    %c0_18 = arith.constant 0 : index
    %41 = vector.load %arg6[%c0_17, %c0_18] : memref<8x128xf32, #tpu.memory_space<vmem>>, vector<8x128xf32>
    tpu.vector_store %arg6[%c0_17, %c0_18], %40 {strides = array<i32>} : memref<8x128xf32, #tpu.memory_space<vmem>>, vector<8x128xf32>,
    %42 = arith.truncf %40 : vector<8x128xf32> to vector<8x128xbf16>
    %c0_19 = arith.constant 0 : index
    %c0_20 = arith.constant 0 : index
    %43 = vector.load %arg7[%c0_19, %c0_20] : memref<8x128xbf16, #tpu.memory_space<vmem>>, vector<8x128xbf16>
    tpu.vector_store %arg7[%c0_19, %c0_20], %42 {strides = array<i32>} : memref<8x128xbf16, #tpu.memory_space<vmem>>, vector<8x128xbf16>,
    return
  }
}

module attributes {stable_mosaic.version = 11 : i64} {
  func.func @_vocab_sample_kernel(%arg0: i32, %arg1: memref<8x128xbf16, #tpu.memory_space<vmem>>, %arg2: memref<1x128x128xbf16, #tpu.memory_space<vmem>>, %arg3: memref<1x128xf32, #tpu.memory_space<vmem>>, %arg4: memref<8x128xf32, #tpu.memory_space<vmem>>, %arg5: memref<8x1xi32, #tpu.memory_space<vmem>>, %arg6: memref<8x128xf32, #tpu.memory_space<vmem>>, %arg7: memref<8x1xf32, #tpu.memory_space<vmem>>, %arg8: memref<8x1xf32, #tpu.memory_space<vmem>>, %arg9: memref<8x1xf32, #tpu.memory_space<vmem>>, %arg10: memref<8x1xf32, #tpu.memory_space<vmem>>, %arg11: memref<8x1xf32, #tpu.memory_space<vmem>>, %arg12: memref<8x1xi32, #tpu.memory_space<vmem>>) attributes {dimension_semantics = [#tpu.dimension_semantics<arbitrary>], iteration_bounds = array<i64: 2>, scalar_prefetch = 0 : i64, scratch_operands = 4 : i64, tpu.core_type = #tpu.core_type<tc>, window_params = [{pipeline_mode = #tpu.pipeline_mode<synchronous>, transform_indices = @transform_0, window_bounds = array<i64: 8, 128>}, {transform_indices = @transform_1, window_bounds = array<i64: 1, 128, 128>}, {transform_indices = @transform_2, window_bounds = array<i64: 1, 128>}, {transform_indices = @transform_3, window_bounds = array<i64: 8, 128>}, {pipeline_mode = #tpu.pipeline_mode<synchronous>, transform_indices = @transform_4, window_bounds = array<i64: 8, 1>}, {transform_indices = @transform_5, window_bounds = array<i64: 8, 128>}, {pipeline_mode = #tpu.pipeline_mode<synchronous>, transform_indices = @transform_6, window_bounds = array<i64: 8, 1>}, {pipeline_mode = #tpu.pipeline_mode<synchronous>, transform_indices = @transform_7, window_bounds = array<i64: 8, 1>}]} {
    %c0_i32 = arith.constant 0 : i32
    %0 = arith.cmpi eq, %arg0, %c0_i32 : i32
    %1 = arith.extui %0 : i1 to i32
    %c0_i32_0 = arith.constant 0 : i32
    %2 = arith.cmpi ne, %1, %c0_i32_0 : i32
    scf.if %2 {
      %cst_37 = arith.constant 0xFF800000 : f32
      %53 = vector.broadcast %cst_37 : f32 to vector<8x1xf32>
      %c0_38 = arith.constant 0 : index
      %c0_39 = arith.constant 0 : index
      %54 = vector.load %arg9[%c0_38, %c0_39] : memref<8x1xf32, #tpu.memory_space<vmem>>, vector<8x1xf32>
      tpu.vector_store %arg9[%c0_38, %c0_39], %53 {strides = array<i32>} : memref<8x1xf32, #tpu.memory_space<vmem>>, vector<8x1xf32>,
      %cst_40 = arith.constant 0.000000e+00 : f32
      %55 = vector.broadcast %cst_40 : f32 to vector<8x1xf32>
      %c0_41 = arith.constant 0 : index
      %c0_42 = arith.constant 0 : index
      %56 = vector.load %arg10[%c0_41, %c0_42] : memref<8x1xf32, #tpu.memory_space<vmem>>, vector<8x1xf32>
      tpu.vector_store %arg10[%c0_41, %c0_42], %55 {strides = array<i32>} : memref<8x1xf32, #tpu.memory_space<vmem>>, vector<8x1xf32>,
      %cst_43 = arith.constant 0xFF800000 : f32
      %57 = vector.broadcast %cst_43 : f32 to vector<8x1xf32>
      %c0_44 = arith.constant 0 : index
      %c0_45 = arith.constant 0 : index
      %58 = vector.load %arg11[%c0_44, %c0_45] : memref<8x1xf32, #tpu.memory_space<vmem>>, vector<8x1xf32>
      tpu.vector_store %arg11[%c0_44, %c0_45], %57 {strides = array<i32>} : memref<8x1xf32, #tpu.memory_space<vmem>>, vector<8x1xf32>,
      %c0_i32_46 = arith.constant 0 : i32
      %59 = vector.broadcast %c0_i32_46 : i32 to vector<8x1xi32>
      %c0_47 = arith.constant 0 : index
      %c0_48 = arith.constant 0 : index
      %60 = vector.load %arg12[%c0_47, %c0_48] : memref<8x1xi32, #tpu.memory_space<vmem>>, vector<8x1xi32>
      tpu.vector_store %arg12[%c0_47, %c0_48], %59 {strides = array<i32>} : memref<8x1xi32, #tpu.memory_space<vmem>>, vector<8x1xi32>,
    } else {
    }
    %c0 = arith.constant 0 : index
    %c0_1 = arith.constant 0 : index
    %3 = vector.load %arg1[%c0, %c0_1] : memref<8x128xbf16, #tpu.memory_space<vmem>>, vector<8x128xbf16>
    %c0_2 = arith.constant 0 : index
    %c0_3 = arith.constant 0 : index
    %c0_4 = arith.constant 0 : index
    %4 = vector.load %arg2[%c0_2, %c0_3, %c0_4] : memref<1x128x128xbf16, #tpu.memory_space<vmem>>, vector<1x128x128xbf16>
    %5 = vector.shape_cast %4 : vector<1x128x128xbf16> to vector<128x128xbf16>
    %cst = arith.constant dense<0.000000e+00> : vector<8x128xf32>
    %6 = tpu.matmul %3, %5, %cst {dimension_numbers = #tpu.dot_dimension_numbers<[1], [0], [0], [1], [0, 0, 1, 1], [], []>} : vector<8x128xbf16>, vector<128x128xbf16>, vector<8x128xf32> -> vector<8x128xf32>
    %c0_5 = arith.constant 0 : index
    %c0_6 = arith.constant 0 : index
    %7 = vector.load %arg3[%c0_5, %c0_6] : memref<1x128xf32, #tpu.memory_space<vmem>>, vector<1x128xf32>
    %8 = vector.broadcast %7 : vector<1x128xf32> to vector<8x128xf32>
    %9 = arith.addf %6, %8 : vector<8x128xf32>
    %c0_7 = arith.constant 0 : index
    %c0_8 = arith.constant 0 : index
    %10 = vector.load %arg6[%c0_7, %c0_8] : memref<8x128xf32, #tpu.memory_space<vmem>>, vector<8x128xf32>
    tpu.vector_store %arg6[%c0_7, %c0_8], %9 {strides = array<i32>} : memref<8x128xf32, #tpu.memory_space<vmem>>, vector<8x128xf32>,
    %cst_9 = arith.constant dense<0xFF800000> : vector<8xf32>
    %11 = vector.multi_reduction <maximumf>, %9, %cst_9 [1] : vector<8x128xf32> to vector<8xf32>
    %12 = vector.shape_cast %11 : vector<8xf32> to vector<8x1xf32>
    %c0_10 = arith.constant 0 : index
    %c0_11 = arith.constant 0 : index
    %13 = vector.load %arg9[%c0_10, %c0_11] : memref<8x1xf32, #tpu.memory_space<vmem>>, vector<8x1xf32>
    %14 = arith.maximumf %13, %12 : vector<8x1xf32>
    %c0_12 = arith.constant 0 : index
    %c0_13 = arith.constant 0 : index
    %15 = vector.load %arg10[%c0_12, %c0_13] : memref<8x1xf32, #tpu.memory_space<vmem>>, vector<8x1xf32>
    %c0_14 = arith.constant 0 : index
    %c0_15 = arith.constant 0 : index
    %16 = vector.load %arg9[%c0_14, %c0_15] : memref<8x1xf32, #tpu.memory_space<vmem>>, vector<8x1xf32>
    %17 = arith.subf %16, %14 : vector<8x1xf32>
    %18 = math.exp %17 : vector<8x1xf32>
    %19 = arith.mulf %15, %18 : vector<8x1xf32>
    %20 = vector.broadcast %14 : vector<8x1xf32> to vector<8x128xf32>
    %21 = arith.subf %9, %20 : vector<8x128xf32>
    %22 = math.exp %21 : vector<8x128xf32>
    %cst_16 = arith.constant dense<0.000000e+00> : vector<8xf32>
    %23 = vector.multi_reduction <add>, %22, %cst_16 [1] : vector<8x128xf32> to vector<8xf32>
    %24 = vector.shape_cast %23 : vector<8xf32> to vector<8x1xf32>
    %25 = arith.addf %19, %24 : vector<8x1xf32>
    %c0_17 = arith.constant 0 : index
    %c0_18 = arith.constant 0 : index
    %26 = vector.load %arg10[%c0_17, %c0_18] : memref<8x1xf32, #tpu.memory_space<vmem>>, vector<8x1xf32>
    tpu.vector_store %arg10[%c0_17, %c0_18], %25 {strides = array<i32>} : memref<8x1xf32, #tpu.memory_space<vmem>>, vector<8x1xf32>,
    %c0_19 = arith.constant 0 : index
    %c0_20 = arith.constant 0 : index
    %27 = vector.load %arg9[%c0_19, %c0_20] : memref<8x1xf32, #tpu.memory_space<vmem>>, vector<8x1xf32>
    tpu.vector_store %arg9[%c0_19, %c0_20], %14 {strides = array<i32>} : memref<8x1xf32, #tpu.memory_space<vmem>>, vector<8x1xf32>,
    %c0_21 = arith.constant 0 : index
    %c0_22 = arith.constant 0 : index
    %28 = vector.load %arg4[%c0_21, %c0_22] : memref<8x128xf32, #tpu.memory_space<vmem>>, vector<8x128xf32>
    %29 = arith.addf %9, %28 : vector<8x128xf32>
    %cst_23 = arith.constant dense<0xFF800000> : vector<8xf32>
    %30 = vector.multi_reduction <maximumf>, %29, %cst_23 [1] : vector<8x128xf32> to vector<8xf32>
    %31 = vector.shape_cast %30 : vector<8xf32> to vector<8x1xf32>
    %32 = tpu.iota {dimensions = array<i32: 1>} : vector<8x128xi32>
    %33 = vector.broadcast %31 : vector<8x1xf32> to vector<8x128xf32>
    %34 = arith.cmpf oge, %29, %33 : vector<8x128xf32>
    %c128_i32 = arith.constant 128 : i32
    %35 = vector.broadcast %c128_i32 : i32 to vector<8x128xi32>
    %36 = arith.select %34, %32, %35 : vector<8x128xi1>, vector<8x128xi32>
    %cst_24 = arith.constant dense<2147483647> : vector<8xi32>
    %37 = vector.multi_reduction <minsi>, %36, %cst_24 [1] : vector<8x128xi32> to vector<8xi32>
    %38 = vector.shape_cast %37 : vector<8xi32> to vector<8x1xi32>
    %c128_i32_25 = arith.constant 128 : i32
    %39 = arith.muli %arg0, %c128_i32_25 : i32
    %40 = vector.broadcast %39 : i32 to vector<8x1xi32>
    %41 = arith.addi %38, %40 : vector<8x1xi32>
    %c0_26 = arith.constant 0 : index
    %c0_27 = arith.constant 0 : index
    %42 = vector.load %arg11[%c0_26, %c0_27] : memref<8x1xf32, #tpu.memory_space<vmem>>, vector<8x1xf32>
    %43 = arith.cmpf ogt, %31, %42 : vector<8x1xf32>
    %c0_28 = arith.constant 0 : index
    %c0_29 = arith.constant 0 : index
    %44 = vector.load %arg12[%c0_28, %c0_29] : memref<8x1xi32, #tpu.memory_space<vmem>>, vector<8x1xi32>
    %45 = arith.select %43, %41, %44 : vector<8x1xi1>, vector<8x1xi32>
    %c0_30 = arith.constant 0 : index
    %c0_31 = arith.constant 0 : index
    %46 = vector.load %arg12[%c0_30, %c0_31] : memref<8x1xi32, #tpu.memory_space<vmem>>, vector<8x1xi32>
    tpu.vector_store %arg12[%c0_30, %c0_31], %45 {strides = array<i32>} : memref<8x1xi32, #tpu.memory_space<vmem>>, vector<8x1xi32>,
    %c0_32 = arith.constant 0 : index
    %c0_33 = arith.constant 0 : index
    %47 = vector.load %arg11[%c0_32, %c0_33] : memref<8x1xf32, #tpu.memory_space<vmem>>, vector<8x1xf32>
    %48 = arith.select %43, %31, %47 : vector<8x1xi1>, vector<8x1xf32>
    %c0_34 = arith.constant 0 : index
    %c0_35 = arith.constant 0 : index
    %49 = vector.load %arg11[%c0_34, %c0_35] : memref<8x1xf32, #tpu.memory_space<vmem>>, vector<8x1xf32>
    tpu.vector_store %arg11[%c0_34, %c0_35], %48 {strides = array<i32>} : memref<8x1xf32, #tpu.memory_space<vmem>>, vector<8x1xf32>,
    %c1_i32 = arith.constant 1 : i32
    %50 = arith.cmpi eq, %arg0, %c1_i32 : i32
    %51 = arith.extui %50 : i1 to i32
    %c0_i32_36 = arith.constant 0 : i32
    %52 = arith.cmpi ne, %51, %c0_i32_36 : i32
    scf.if %52 {
      %c0_37 = arith.constant 0 : index
      %c0_38 = arith.constant 0 : index
      %53 = vector.load %arg12[%c0_37, %c0_38] : memref<8x1xi32, #tpu.memory_space<vmem>>, vector<8x1xi32>
      %c0_39 = arith.constant 0 : index
      %c0_40 = arith.constant 0 : index
      %54 = vector.load %arg5[%c0_39, %c0_40] : memref<8x1xi32, #tpu.memory_space<vmem>>, vector<8x1xi32>
      tpu.vector_store %arg5[%c0_39, %c0_40], %53 {strides = array<i32>} : memref<8x1xi32, #tpu.memory_space<vmem>>, vector<8x1xi32>,
      %c0_41 = arith.constant 0 : index
      %c0_42 = arith.constant 0 : index
      %55 = vector.load %arg9[%c0_41, %c0_42] : memref<8x1xf32, #tpu.memory_space<vmem>>, vector<8x1xf32>
      %c0_43 = arith.constant 0 : index
      %c0_44 = arith.constant 0 : index
      %56 = vector.load %arg7[%c0_43, %c0_44] : memref<8x1xf32, #tpu.memory_space<vmem>>, vector<8x1xf32>
      tpu.vector_store %arg7[%c0_43, %c0_44], %55 {strides = array<i32>} : memref<8x1xf32, #tpu.memory_space<vmem>>, vector<8x1xf32>,
      %c0_45 = arith.constant 0 : index
      %c0_46 = arith.constant 0 : index
      %57 = vector.load %arg10[%c0_45, %c0_46] : memref<8x1xf32, #tpu.memory_space<vmem>>, vector<8x1xf32>
      %c0_47 = arith.constant 0 : index
      %c0_48 = arith.constant 0 : index
      %58 = vector.load %arg8[%c0_47, %c0_48] : memref<8x1xf32, #tpu.memory_space<vmem>>, vector<8x1xf32>
      tpu.vector_store %arg8[%c0_47, %c0_48], %57 {strides = array<i32>} : memref<8x1xf32, #tpu.memory_space<vmem>>, vector<8x1xf32>,
    } else {
    }
    return
  }
  func.func @transform_0(%arg0: i32) -> (i32, i32) {
    %c0_i32 = arith.constant 0 : i32
    %c0_i32_0 = arith.constant 0 : i32
    %c0_i32_1 = arith.constant 0 : i32
    return %c0_i32, %c0_i32_0 : i32, i32
  }
  func.func @transform_1(%arg0: i32) -> (i32, i32, i32) {
    %c0_i32 = arith.constant 0 : i32
    %c0_i32_0 = arith.constant 0 : i32
    %c0_i32_1 = arith.constant 0 : i32
    return %arg0, %c0_i32, %c0_i32_0 : i32, i32, i32
  }
  func.func @transform_2(%arg0: i32) -> (i32, i32) {
    %c0_i32 = arith.constant 0 : i32
    %c0_i32_0 = arith.constant 0 : i32
    return %c0_i32, %arg0 : i32, i32
  }
  func.func @transform_3(%arg0: i32) -> (i32, i32) {
    %c0_i32 = arith.constant 0 : i32
    %c0_i32_0 = arith.constant 0 : i32
    return %c0_i32, %arg0 : i32, i32
  }
  func.func @transform_4(%arg0: i32) -> (i32, i32) {
    %c0_i32 = arith.constant 0 : i32
    %c0_i32_0 = arith.constant 0 : i32
    %c0_i32_1 = arith.constant 0 : i32
    return %c0_i32, %c0_i32_0 : i32, i32
  }
  func.func @transform_5(%arg0: i32) -> (i32, i32) {
    %c0_i32 = arith.constant 0 : i32
    %c0_i32_0 = arith.constant 0 : i32
    return %c0_i32, %arg0 : i32, i32
  }
  func.func @transform_6(%arg0: i32) -> (i32, i32) {
    %c0_i32 = arith.constant 0 : i32
    %c0_i32_0 = arith.constant 0 : i32
    %c0_i32_1 = arith.constant 0 : i32
    return %c0_i32, %c0_i32_0 : i32, i32
  }
  func.func @transform_7(%arg0: i32) -> (i32, i32) {
    %c0_i32 = arith.constant 0 : i32
    %c0_i32_0 = arith.constant 0 : i32
    %c0_i32_1 = arith.constant 0 : i32
    return %c0_i32, %c0_i32_0 : i32, i32
  }
}

</mosaic_0001>

<bundles_post_ra>
// kernel: _forward.5
= control target key start
LH: loop header
LB: loop body
LE: loop exit
PB: predicated region body
PF: predicated region fallthrough
CT: control target
= control target key end

     0   :  { %s290_s12 = smov 0   ;;  %s313_s0 = inlined_call_operand.vmem [shape: f32[8,256], index: 0, kind: input, shape index: {}, may-alias: {0,3}]   ;;  %s314_s1 = inlined_call_operand.vmem [shape: f32[8,1], index: 1, kind: input, shape index: {}]   ;;  %s315_s2 = inlined_call_operand.vmem [shape: f32[8,1], index: 2, kind: input, shape index: {}]   ;;  %s316_s3 = inlined_call_operand.vmem [shape: f32[8,256], index: 3, kind: output, shape index: {}, may-alias: {0,3}]  }
   0x1 LB: > { %s238_s13 = sadd.s32 4294967295, %s267_s12   ;;  %p242_p0 = scmp.ge.s32.totalorder %s267_s12, 1  ;;  %s267_s12 = sphi %s290_s12, %s13_s12  }
   0x2   : > { %p136_p1 = scmp.lt.s32.totalorder %s267_s12, 3 }
   0x4   : > { %p137_p2 = pnand %p242_p0, %p136_p1 }
   0x5   : > { %v169_v0 = vld [vmem:[%s314_s1] sm:$0xff] (!%p137_p2)  ;;  %v269_v2 = vmov (!%p137_p2), 0   ;;  %p158_p3 = scmp.lt.s32.totalorder (!%p137_p2), %s238_s13, 1 }
   0x6   : > { %140 = sbr.rel (%p137_p2) target bundleno = 153 (0x99), region = 32  ;;  %v166_v1 = vld [vmem:[%s315_s2] sm:$0xff] (!%p137_p2)  ;;  %256 = vset.pattern.permute.xlu0 (!%p137_p2), %v269_v2 }
   0x7   : > { %257 = vrcp.f32 (!%p137_p2), %v166_v1  ;;  %172 = vperm.xlu0 (!%p137_p2), %256, %v169_v0  }
   0xd   : > { %s318_s13 = smov (!%p158_p3, %s238_s13), 1 }
   0xe   : > { %s243_s18 = sshll.u32 %s318_s13, 3 }
   0xf   : > { %s161_s21 = scalar_lea.vmem %s313_s0, %s243_s18  ;;  %s165_s24 = scalar_lea.vmem %s316_s3, %s243_s18 }
  0x10   : > { %v168_v4 = vld [vmem:[%s161_s21] sm:$0xff] }
  0x11   : > { %v258_v3 = vpop.eup %257 }
  0x12   : > { %180 = vperm.xlu0 %256, %v258_v3  }
  0x86   : > { %v173_v5 = vpop.permute.xlu0 %172 }
  0x87   : > { %v175_v6 = vsub.f32 %v168_v4, %v173_v5 }
  0x89   : > { %v176_v7 = vmul.f32 1.442695, %v175_v6 }
  0x8b   : > { %259 = vpow2.f32 %v176_v7 }
  0x91   : > { %v181_v9 = vpop.permute.xlu0 %180 }
  0x95   : > { %v260_v8 = vpop.eup %259 }
  0x96   : > { %v183_v10 = vmul.f32 %v260_v8, %v181_v9 }
  0x98   : > { %184 = vst [vmem:[%s165_s24] sm:$0xff] %v183_v10 }
  0x99 PF: > { %s13_s12 = sadd.s32 1, %s267_s12  }
  0x9a   : > { %p10_p4 = scmp.ge.s32.totalorder %s13_s12, 4  }
  0x9c   :  { %12 = sbr.rel (!%p10_p4) target bundleno = 1 (0x1), region = 62 }

// kernel: _forward.4
= control target key start
LH: loop header
LB: loop body
LE: loop exit
PB: predicated region body
PF: predicated region fallthrough
CT: control target
= control target key end

     0   :  { %s716_s24 = smov 0   ;;  %s793_s0 = inlined_call_operand.vmem [shape: bf16[8,128], index: 0, kind: input, shape index: {}]   ;;  %s794_s1 = inlined_call_operand.vmem [shape: bf16[2,128,128], index: 1, kind: input, shape index: {}]   ;;  %s795_s2 = inlined_call_operand.vmem [shape: f32[1,256], index: 2, kind: input, shape index: {}]   ;;  %s796_s3 = inlined_call_operand.vmem [shape: f32[8,256], index: 3, kind: input, shape index: {}]   ;;  %s797_s4 = inlined_call_operand.vmem [shape: s32[8,1], index: 4, kind: output, shape index: {0}]   ;;  %s798_s5 = inlined_call_operand.vmem [shape: f32[8,256], index: 5, kind: output, shape index: {1}]   ;;  %s799_s6 = inlined_call_operand.vmem [shape: f32[8,1], index: 6, kind: output, shape index: {2}]   ;;  %s800_s7 = inlined_call_operand.vmem [shape: f32[8,1], index: 7, kind: output, shape index: {3}]  }
   0x1 LB: > { %s722_s25 = sadd.s32 4294967295, %s668_s24   ;;  %p585_p0 = scmp.ge.s32.totalorder %s668_s24, 1  ;;  %s668_s24 = sphi %s716_s24, %s18_s24  }
   0x2   : > { %p246_p1 = scmp.lt.s32.totalorder %s668_s24, 3 }
   0x4   : > { %p247_p2 = pnand %p585_p0, %p246_p1 }
   0x5   : > { %p284_p3 = scmp.lt.s32.totalorder (!%p247_p2), %s722_s25, 1  ;;  %p590_p4 = scmp.ne.s32.totalorder (!%p247_p2), %s722_s25, 0 }
   0x6   : > { %250 = sbr.rel (%p247_p2) target bundleno = 756 (0x2f4), region = 36 }
   0xd   : > { %s728_s26 = scalar_select %p284_p3, %s722_s25, 1 }
   0xe   : > { %304 = sbr.rel (%p590_p4) target bundleno = 21 (0x15), region = 40  ;;  %vm305_vm0 = vcmask (!%p590_p4), 7168   ;;  %v670_v0 = vmov (!%p590_p4), -inf   ;;  %v671_v1 = vmov (!%p590_p4), 0.0   ;;  %v672_v2 = vmov (!%p590_p4), 0  }
   0xf   : > { %s604_s27 = sshll.u32 %s728_s26, 6  ;;  %s291_s30 = scalar_lea.vmem %s795_s2, %s728_s26  ;;  %306 = vst.msk [vmem:[#allocation2] sm:$0xff] (!%p590_p4), %vm305_vm0, %v670_v0  ;;  %308 = vst.msk [vmem:[#allocation4] sm:$0xff] (!%p590_p4), %vm305_vm0, %v670_v0 }
  0x10   : > { %s738_s10 = scalar_lea.vmem %s794_s1, %s604_s27  ;;  %s588_s11 = sshll.u32 %s728_s26, 3  ;;  %307 = vst.msk [vmem:[#allocation3] sm:$0xff] (!%p590_p4), %vm305_vm0, %v671_v1  ;;  %309 = vst.msk [vmem:[#allocation5] sm:$0xff] (!%p590_p4), %vm305_vm0, %v672_v2 }
  0x11   : > { %s744_s14 = scalar_lea.vmem %s796_s3, %s588_s11  ;;  %s749_s17 = scalar_lea.vmem %s798_s5, %s588_s11 }
  0x15 PF: > { %v650_v3 = vld [vmem:[%s738_s10] sm:$0xff]   ;;  %v673_v4 = vmov 0.0   ;;  %v651_v5 = vld [vmem:[%s738_s10 + $0x8] sm:$0xff]   ;;  %vm674_vm1 = vmmov 0   ;;  %v652_v6 = vld [vmem:[%s738_s10 + $0x10] sm:$0xff]   ;;  %v675_v21 = vmov 0   ;;  %v450_v29 = vlaneseq }
  0x16   : > { %614 = vmatprep.subr.bf16.mxu0 %v673_v4  ;;  %630 = vmatprep.mubr.msk.bf16.mxu0 %vm674_vm1, %v673_v4  ;;  %v653_v7 = vld [vmem:[%s738_s10 + $0x18] sm:$0xff]   ;;  %v654_v8 = vld [vmem:[%s738_s10 + $0x20] sm:$0xff]   ;;  %v655_v9 = vld [vmem:[%s738_s10 + $0x28] sm:$0xff]   ;;  %vm443_vm2 = vcmask 7168   ;;  %s600_s22 = sshll.u32 %s722_s25, 7  ;;  %p601_p5 = scmp.ne.s32.totalorder %s722_s25, 1 }
  0x17   : > { %615 = vmatpush3.bf16.msra.mxu0 %v650_v3  ;;  %v656_v10 = vld [vmem:[%s738_s10 + $0x30] sm:$0xff]   ;;  %v657_v11 = vld [vmem:[%s738_s10 + $0x38] sm:$0xff]   ;;  %v310_v12 = vld [vmem:[%s793_s0] sm:$0xf]  ;;  %648 = vset.pattern.permute.xlu1 %v675_v21  ;;  %v451_v30 = vand.u32 127, %v450_v29  ;;  %v469_v49 = vstv %s600_s22 }
  0x18   : > { %616 = vmatprep.subr.bf16.mxu0 %v673_v4  ;;  %v591_v13 = vld [vmem:[%s291_s30] ss:$0 sm:$0xff]  ;;  %649 = vset.pattern.permute.xlu0 %v675_v21  ;;  %v471_v22 = vld [vmem:[#allocation4] sm:$0xff]  ;;  %v427_v46 = vld [vmem:[#allocation3] sm:$0xff] }
  0x19   : > { %v446_v15 = vld [vmem:[%s744_s14] sm:$0xff]  ;;  %v473_v52 = vld [vmem:[#allocation5] sm:$0xff] }
  0x1a   : > { %v425_v25 = vld [vmem:[#allocation2] sm:$0xff] }
  0x1b   : > { %617 = vmatpush3.bf16.msra.mxu0 %v651_v5 }
  0x1c   : > { %618 = vmatprep.subr.bf16.mxu0 %v673_v4 }
  0x1f   : > { %619 = vmatpush3.bf16.msra.mxu0 %v652_v6 }
  0x20   : > { %620 = vmatprep.subr.bf16.mxu0 %v673_v4 }
  0x23   : > { %621 = vmatpush3.bf16.msra.mxu0 %v653_v7 }
  0x24   : > { %622 = vmatprep.subr.bf16.mxu0 %v673_v4 }
  0x27   : > { %623 = vmatpush3.bf16.msra.mxu0 %v654_v8 }
  0x28   : > { %624 = vmatprep.subr.bf16.mxu0 %v673_v4 }
  0x2b   : > { %625 = vmatpush3.bf16.msra.mxu0 %v655_v9 }
  0x2c   : > { %626 = vmatprep.subr.bf16.mxu0 %v673_v4 }
  0x2f   : > { %627 = vmatpush3.bf16.msra.mxu0 %v656_v10 }
  0x30   : > { %628 = vmatprep.subr.bf16.mxu0 %v673_v4 }
  0x33   : > { %629 = vmatpush3.bf16.msra.mxu0 %v657_v11 }
  0x36   : > { %631 = vmatmul.mubr.bf16.vlgmr.msra.gmra.mrb[0].mxu0 %v310_v12 }
 0x109   : > { %v416_v14 = vpop.f32.mrb[0].mxu0 }
 0x10a   : > { %v417_v16 = vadd.f32 %v591_v13, %v416_v14  ;;  %v632_v17 = vpop.f32.mrb[1].mxu0 }
 0x10b   : > { %v419_v18 = vpop.f32.mrb[2].mxu0 }
 0x10c   : > { %422 = vst [vmem:[%s749_s17] sm:$0xff] %v417_v16  ;;  %v633_v19 = vpop.f32.mrb[3].mxu0  ;;  %v447_v20 = vadd.f32 %v446_v15, %v417_v16 }
 0x10e   : > { %448 = vmax.xlane.f32.xlu0 %v447_v20 }
 0x112   : > { %423 = vmax.xlane.f32.xlu0 %v417_v16 }
 0x19b   : > { %v449_v23 = vpop.xlane.xlu0 %448 }
 0x19c   : > { %vm472_vm3 = vcmp.gt.f32.partialorder %v449_v23, %v471_v22  ;;  %vm452_vm4 = vcmp.ge.f32.partialorder %v447_v20, %v449_v23 }
 0x19d   : > { %v477_v24 = vsel %vm472_vm3, %v449_v23, %v471_v22  ;;  %v453_v31 = vsel %vm452_vm4, %v451_v30, 128 }
 0x19e   : > { %478 = vst.msk [vmem:[#allocation4] sm:$0xff] %vm443_vm2, %v477_v24  ;;  %v455_v32 = vshra.s32 %v453_v31, 16  ;;  %v454_v37 = vand.u32 65535, %v453_v31 }
 0x19f   : > { %v424_v26 = vpop.xlane.xlu0 %423 }
 0x1a0   : > { %v426_v27 = vmax.f32 %v425_v25, %v424_v26  ;;  %v457_v33 = vcvt.s32.f32 %v455_v32  ;;  %v456_v39 = vcvt.s32.f32 %v454_v37 }
 0x1a2   : > { %v428_v28 = vsub.f32 %v425_v25, %v426_v27  ;;  %445 = vst.msk [vmem:[#allocation2] sm:$0xff] %vm443_vm2, %v426_v27  ;;  %434 = vperm.xlu1 %648, %v426_v27  }
 0x1a4   : > { %v429_v42 = vmul.f32 1.442695, %v428_v28 }
 0x1a9   : > { %v485_v58 = vld [vmem:[#allocation2] sm:$0xff] (!%p601_p5) }
 0x1aa   : > { %486 = vst.msk [vmem:[%s799_s6] sm:$0xff] (!%p601_p5), %vm443_vm2, %v485_v58 }
 0x1c6   : > { %458 = vmin.xlane.f32.xlu1 %v457_v33 }
 0x221   : > { %v435_v34 = vpop.permute.xlu1 %434 }
 0x222   : > { %v437_v35 = vsub.f32 %v417_v16, %v435_v34 }
 0x224   : > { %v438_v36 = vmul.f32 1.442695, %v437_v35 }
 0x226   : > { %658 = vpow2.f32 %v438_v36 }
 0x227   : > { %660 = vpow2.f32 %v429_v42 }
 0x230   : > { %v659_v41 = vpop.eup %658 }
 0x231   : > { %v661_v44 = vpop.eup %660 }
 0x232   : > { %v431_v51 = vmul.f32 %v661_v44, %v427_v46 }
 0x253   : > { %v459_v38 = vpop.xlane.xlu1 %458 }
 0x254   : > { %vm460_vm5 = vcmp.eq.f32.partialorder %v457_v33, %v459_v38  ;;  %v465_v43 = vcvt.f32.s32 %v459_v38 }
 0x255   : > { %v461_v40 = vsel %vm460_vm5, %v456_v39, inf }
 0x256   : > { %462 = vmin.xlane.f32.xlu0 %v461_v40  ;;  %v466_v47 = vshll.u32 %v465_v43, 16 }
 0x25a   : > { %440 = vadd.xlane.f32.xlu0 %v659_v41 }
 0x2e3   : > { %v463_v45 = vpop.xlane.xlu0 %462 }
 0x2e4   : > { %v464_v48 = vcvt.f32.s32 %v463_v45 }
 0x2e5   : > { %482 = sbr.rel (%p601_p5) target bundleno = 756 (0x2f4), region = 44 }
 0x2e6   : > { %v467_v50 = vadd.s32 %v466_v47, %v464_v48 }
 0x2e7   : > { %v441_v53 = vpop.xlane.xlu0 %440 }
 0x2e8   : > { %v470_v54 = vadd.s32 %v469_v49, %v467_v50  ;;  %v442_v55 = vadd.f32 %v441_v53, %v431_v51 }
 0x2ea   : > { %v474_v56 = vsel %vm472_vm3, %v470_v54, %v473_v52  ;;  %444 = vst.msk [vmem:[#allocation3] sm:$0xff] %vm443_vm2, %v442_v55 }
 0x2eb   : > { %475 = vst.msk [vmem:[#allocation5] sm:$0xff] %vm443_vm2, %v474_v56 }
 0x2f1   : > { %v487_v59 = vld [vmem:[#allocation3] sm:$0xff] }
 0x2f2   : > { %v483_v57 = vld [vmem:[#allocation5] sm:$0xff]  ;;  %488 = vst.msk [vmem:[%s800_s7] sm:$0xff] %vm443_vm2, %v487_v59 }
 0x2f3   : > { %484 = vst.msk [vmem:[%s797_s4] sm:$0xff] %vm443_vm2, %v483_v57 }
 0x2f4 PF: > { %s18_s24 = sadd.s32 1, %s668_s24  }
 0x2f5   : > { %p15_p6 = scmp.ge.s32.totalorder %s18_s24, 4  }
 0x2f7   :  { %17 = sbr.rel (!%p15_p6) target bundleno = 1 (0x1), region = 104 }

// kernel: _forward.3
= control target key start
LH: loop header
LB: loop body
LE: loop exit
PB: predicated region body
PF: predicated region fallthrough
CT: control target
= control target key end

     0   :  { %13 = vsyncpa [#allocation3], 0  ;;  %s1015_s0 = inlined_call_operand.vmem [shape: f32[8,128], index: 0, kind: input, shape index: {}]   ;;  %s1016_s1 = inlined_call_operand.vmem [shape: f32[8,128], index: 1, kind: input, shape index: {}]   ;;  %s1017_s2 = inlined_call_operand.hbm [shape: bf16[128,384], index: 2, kind: input, shape index: {}]   ;;  %s1018_s3 = inlined_call_operand.vmem [shape: f32[1,384], index: 3, kind: input, shape index: {}]   ;;  %s1019_s4 = inlined_call_operand.hbm [shape: bf16[128,384], index: 4, kind: input, shape index: {}]   ;;  %s1020_s5 = inlined_call_operand.vmem [shape: f32[1,384], index: 5, kind: input, shape index: {}]   ;;  %s1021_s6 = inlined_call_operand.hbm [shape: f32[8,128], index: 6, kind: output, shape index: {0}]   ;;  %s1022_s7 = inlined_call_operand.vmem [shape: bf16[8,128], index: 7, kind: output, shape index: {1}]  }
   0x1   :  { %14 = vsyncpa [#allocation6], 0 }
   0x2   :  { %15 = vsyncpa [#allocation4], 0  ;;  %s889_s24 = smov [#allocation2]   ;;  %s817_s28 = scalar_lea.hbm %s1017_s2, 3072 }
   0x3   :  { %s25_s25 = sshll.u32 %s889_s24, 4  ;;  %p818_p0 = scmp.ne.s32.totalorder %s1017_s2, %s817_s28  ;;  %s26_s25 = int_to_ptr.vmem [resolvable:$true] %s25_s25 }
   0x4   :  { %p821_p1 = scmp.lt.u32.totalorder %s817_s28, %s1017_s2 }
   0x6   :  { %p823_p2 = pnand %p821_p1, %p818_p0 }
   0x8   :  { %826 = shalt.err (!%p823_p2)
}
   0x9   :  { %s827_s10 = scalar_lea.vmem %s26_s25, 3072  ;;  %p832_p4 = scmp.lt.s32.totalorder %s26_s25, %s26_s25 }
   0xa   :  { %p828_p3 = scmp.ne.s32.totalorder %s26_s25, %s827_s10  ;;  %p833_p5 = scmp.lt.s32.totalorder %s827_s10, %s827_s10 }
   0xc   :  { %p834_p6 = por %p833_p5, %p832_p4 }
   0xe   :  { %p835_p7 = pnand %p834_p6, %p828_p3 }
  0x10   :  { %838 = shalt.err (!%p835_p7)
}
  0x11   :  { %s890_s11 = smov 192   ;;  %s891_s12 = smov 12  }
  0x12   :  { %31 = dma.hbm_to_vmem [thread:$0]  %s1017_s2, 3072, %s26_s25, [#allocation3], %s890_s11, %s890_s11, %s891_s12  }
  0x13   :  { %s892_s15 = smov [#allocation5]   ;;  %s839_s19 = scalar_lea.hbm %s1019_s4, 3072 }
  0x14   :  { %s39_s16 = sshll.u32 %s892_s15, 4  ;;  %p840_p8 = scmp.ne.s32.totalorder %s1019_s4, %s839_s19  ;;  %s40_s16 = int_to_ptr.vmem [resolvable:$true] %s39_s16 }
  0x15   :  { %p843_p9 = scmp.lt.u32.totalorder %s839_s19, %s1019_s4 }
  0x17   :  { %p845_p10 = pnand %p843_p9, %p840_p8 }
  0x19   :  { %848 = shalt.err (!%p845_p10)
}
  0x1a   :  { %s849_s24 = scalar_lea.vmem %s40_s16, 3072  ;;  %p854_p12 = scmp.lt.s32.totalorder %s40_s16, %s40_s16 }
  0x1b   :  { %p850_p11 = scmp.ne.s32.totalorder %s40_s16, %s849_s24  ;;  %p855_p13 = scmp.lt.s32.totalorder %s849_s24, %s849_s24 }
  0x1d   :  { %p856_p0 = por %p855_p13, %p854_p12 }
  0x1f   :  { %p857_p1 = pnand %p856_p0, %p850_p11 }
  0x21   :  { %860 = shalt.err (!%p857_p1)
}
  0x22   :  { %45 = dma.hbm_to_vmem [thread:$0]  %s1019_s4, 3072, %s40_s16, [#allocation6], %s890_s11, %s890_s11, %s891_s12  }
  0x23   :  { %883 = dma.done.wait [#allocation3], 3072  }
  0x24   :  { %884 = vsyncadd [#allocation3], 4294964224 }
  0x25   :  { %885 = dma.done.wait [#allocation6], 3072  }
  0x26   :  { %886 = vsyncadd [#allocation6], 4294964224  ;;  %v893_v0 = vmov 0.0   ;;  %v894_v1 = vmov 0   ;;  %vm895_vm0 = vmmov 0   ;;  %v55_v23 = vld [vmem:[%s1015_s0] sm:$0xff]  ;;  %v93_v58 = vlaneseq }
  0x27   :  { %687 = vmatprep.subr.bf16.mxu1 %v893_v0  ;;  %268 = vmatprep.mubr.bf16.mxu0 %v894_v1  ;;  %v743_v2 = vld [vmem:[#allocation2 + $0x4] ss:$12 sps:$4 sm:$0xff]   ;;  %v745_v3 = vld [vmem:[#allocation2] ss:$12 sps:$4 sm:$0xff]   ;;  %v746_v4 = vld [vmem:[#allocation2 + $0x1c] ss:$12 sps:$4 sm:$0xff]   ;;  %v56_v26 = vpack.c.bf16 %v55_v23, %v55_v23 }
  0x28   :  { %703 = vmatprep.mubr.msk.bf16.mxu1 %vm895_vm0, %v893_v0  ;;  %236 = vmatprep.subr.bf16.mxu0 %v743_v2  ;;  %v748_v5 = vld [vmem:[#allocation2 + $0x18] ss:$12 sps:$4 sm:$0xff]   ;;  %v749_v6 = vld [vmem:[#allocation2 + $0x34] ss:$12 sps:$4 sm:$0xff]   ;;  %v751_v7 = vld [vmem:[#allocation2 + $0x30] ss:$12 sps:$4 sm:$0xff]  }
  0x29   :  { %237 = vmatpush1.bf16.msra.mxu0 %v745_v3  ;;  %v752_v8 = vld [vmem:[#allocation2 + $0x4c] ss:$12 sps:$4 sm:$0xff]   ;;  %v763_v9 = vld [vmem:[#allocation2 + $0x8] ss:$12 sps:$4 sm:$0xff]   ;;  %v755_v11 = vld [vmem:[#allocation2 + $0x64] ss:$12 sps:$4 sm:$0xff]  }
  0x2a   :  { %238 = vmatprep.subr.bf16.mxu0 %v746_v4  ;;  %v754_v10 = vld [vmem:[#allocation2 + $0x48] ss:$12 sps:$4 sm:$0xff]   ;;  %688 = vmatpush3.bf16.msra.mxu1 %v763_v9  ;;  %v767_v12 = vld [vmem:[#allocation2 + $0x20] ss:$12 sps:$4 sm:$0xff]   ;;  %v769_v14 = vld [vmem:[#allocation2 + $0x38] ss:$12 sps:$4 sm:$0xff]  }
  0x2b   :  { %689 = vmatprep.subr.bf16.mxu1 %v893_v0  ;;  %v757_v13 = vld [vmem:[#allocation2 + $0x60] ss:$12 sps:$4 sm:$0xff]   ;;  %v758_v15 = vld [vmem:[#allocation2 + $0x7c] ss:$12 sps:$4 sm:$0xff]   ;;  %v760_v16 = vld [vmem:[#allocation2 + $0x78] ss:$12 sps:$4 sm:$0xff]  }
  0x2c   :  { %v773_v17 = vld [vmem:[#allocation2 + $0x50] ss:$12 sps:$4 sm:$0xff]   ;;  %v761_v18 = vld [vmem:[#allocation2 + $0x94] ss:$12 sps:$4 sm:$0xff]   ;;  %v765_v21 = vld [vmem:[#allocation2 + $0xac] ss:$12 sps:$4 sm:$0xff]  }
  0x2d   :  { %239 = vmatpush1.bf16.msra.mxu0 %v748_v5  ;;  %v764_v19 = vld [vmem:[#allocation2 + $0x90] ss:$12 sps:$4 sm:$0xff]   ;;  %v777_v20 = vld [vmem:[#allocation2 + $0x68] ss:$12 sps:$4 sm:$0xff]   ;;  %v781_v24 = vld [vmem:[#allocation2 + $0x80] ss:$12 sps:$4 sm:$0xff]  }
  0x2e   :  { %240 = vmatprep.subr.bf16.mxu0 %v749_v6  ;;  %690 = vmatpush3.bf16.msra.mxu1 %v767_v12  ;;  %v768_v22 = vld [vmem:[#allocation2 + $0xa8] ss:$12 sps:$4 sm:$0xff]   ;;  %v772_v25 = vld [vmem:[#allocation5 + $0x4] ss:$12 sps:$4 sm:$0xff]   ;;  %v770_v27 = vld [vmem:[#allocation5] ss:$12 sps:$4 sm:$0xff]  }
  0x2f   :  { %691 = vmatprep.subr.bf16.mxu1 %v893_v0  ;;  %v785_v28 = vld [vmem:[#allocation2 + $0x98] ss:$12 sps:$4 sm:$0xff]   ;;  %v776_v29 = vld [vmem:[#allocation5 + $0x1c] ss:$12 sps:$4 sm:$0xff]   ;;  %v780_v32 = vld [vmem:[#allocation5 + $0x34] ss:$12 sps:$4 sm:$0xff]  }
  0x30   :  { %v774_v30 = vld [vmem:[#allocation5 + $0x18] ss:$12 sps:$4 sm:$0xff]   ;;  %v789_v31 = vld [vmem:[#allocation2 + $0xb0] ss:$12 sps:$4 sm:$0xff]   ;;  %v796_v34 = vld [vmem:[#allocation5 + $0x8] ss:$12 sps:$4 sm:$0xff]  }
  0x31   :  { %241 = vmatpush1.bf16.msra.mxu0 %v751_v7  ;;  %v778_v33 = vld [vmem:[#allocation5 + $0x30] ss:$12 sps:$4 sm:$0xff]   ;;  %v784_v35 = vld [vmem:[#allocation5 + $0x4c] ss:$12 sps:$4 sm:$0xff]   ;;  %v782_v36 = vld [vmem:[#allocation5 + $0x48] ss:$12 sps:$4 sm:$0xff]  }
  0x32   :  { %242 = vmatprep.subr.bf16.mxu0 %v752_v8  ;;  %692 = vmatpush3.bf16.msra.mxu1 %v769_v14  ;;  %v800_v37 = vld [vmem:[#allocation5 + $0x20] ss:$12 sps:$4 sm:$0xff]   ;;  %v788_v38 = vld [vmem:[#allocation5 + $0x64] ss:$12 sps:$4 sm:$0xff]   ;;  %v792_v41 = vld [vmem:[#allocation5 + $0x7c] ss:$12 sps:$4 sm:$0xff]  }
  0x33   :  { %693 = vmatprep.subr.bf16.mxu1 %v893_v0  ;;  %v786_v39 = vld [vmem:[#allocation5 + $0x60] ss:$12 sps:$4 sm:$0xff]   ;;  %v801_v40 = vld [vmem:[#allocation5 + $0x38] ss:$12 sps:$4 sm:$0xff]   ;;  %v802_v43 = vld [vmem:[#allocation5 + $0x50] ss:$12 sps:$4 sm:$0xff]  }
  0x34   :  { %v790_v42 = vld [vmem:[#allocation5 + $0x78] ss:$12 sps:$4 sm:$0xff]   ;;  %v795_v44 = vld [vmem:[#allocation5 + $0x94] ss:$12 sps:$4 sm:$0xff]   ;;  %v793_v45 = vld [vmem:[#allocation5 + $0x90] ss:$12 sps:$4 sm:$0xff]  }
  0x35   :  { %243 = vmatpush1.bf16.msra.mxu0 %v754_v10  ;;  %v803_v46 = vld [vmem:[#allocation5 + $0x68] ss:$12 sps:$4 sm:$0xff]   ;;  %v799_v47 = vld [vmem:[#allocation5 + $0xac] ss:$12 sps:$4 sm:$0xff]   ;;  %v986_v49 = vld [vmem:[%s1016_s1] sm:$0xff]  ;;  %v94_v59 = vshrl.u32 %v93_v58, 7 }
  0x36   :  { %244 = vmatprep.subr.bf16.mxu0 %v755_v11  ;;  %694 = vmatpush3.bf16.msra.mxu1 %v773_v17  ;;  %v797_v48 = vld [vmem:[#allocation5 + $0xa8] ss:$12 sps:$4 sm:$0xff]   ;;  %v804_v50 = vld [vmem:[#allocation5 + $0x80] ss:$12 sps:$4 sm:$0xff]   ;;  %v58_v51 = vpack.c.bf16 %v986_v49, %v986_v49  ;;  %v805_v52 = vld [vmem:[#allocation5 + $0x98] ss:$12 sps:$4 sm:$0xff]  }
  0x37   :  { %695 = vmatprep.subr.bf16.mxu1 %v893_v0  ;;  %v806_v53 = vld [vmem:[#allocation5 + $0xb0] ss:$12 sps:$4 sm:$0xff]   ;;  %v95_v60 = vsub.s32 0, %v94_v59  ;;  %v349_v61 = vld [vmem:[%s1020_s5] sm:$0x7]  ;;  %v99_v63 = vsub.s32 1, %v94_v59 }
  0x38   :  { %v91_v62 = vld [vmem:[%s1018_s3] sm:$0x7]  ;;  %s896_s3 = smov [#allocation7]  }
  0x39   :  { %245 = vmatpush1.bf16.msra.mxu0 %v757_v13  ;;  %v100_v2 = vrot.slane %v91_v62, %v99_v63  ;;  %v358_v3 = vrot.slane %v349_v61, %v99_v63  ;;  %s605_s5 = sshll.u32 %s896_s3, 4  ;;  %s606_s5 = int_to_ptr.vmem [resolvable:$true] %s605_s5 }
  0x3a   :  { %246 = vmatprep.subr.bf16.mxu0 %v758_v15  ;;  %696 = vmatpush3.bf16.msra.mxu1 %v777_v20  ;;  %v103_v20 = vsub.s32 2, %v94_v59  ;;  %s861_s8 = scalar_lea.vmem %s606_s5, 128  ;;  %p866_p3 = scmp.lt.s32.totalorder %s606_s5, %s606_s5 }
  0x3b   :  { %697 = vmatprep.subr.bf16.mxu1 %v893_v0  ;;  %v729_v6 = vadd.f32 %v358_v3, %v100_v2  ;;  %p862_p2 = scmp.ne.s32.totalorder %s606_s5, %s861_s8  ;;  %p867_p4 = scmp.lt.s32.totalorder %s861_s8, %s861_s8 }
  0x3c   :  { %v104_v23 = vrot.slane %v91_v62, %v103_v20 }
  0x3d   :  { %247 = vmatpush1.bf16.msra.mxu0 %v760_v16  ;;  %p868_p5 = por %p867_p4, %p866_p3 }
  0x3e   :  { %248 = vmatprep.subr.bf16.mxu0 %v761_v18  ;;  %698 = vmatpush3.bf16.msra.mxu1 %v781_v24 }
  0x3f   :  { %699 = vmatprep.subr.bf16.mxu1 %v893_v0  ;;  %p869_p6 = pnand %p868_p5, %p862_p2 }
  0x41   :  { %249 = vmatpush1.bf16.msra.mxu0 %v764_v19 }
  0x42   :  { %250 = vmatprep.subr.bf16.mxu0 %v765_v21  ;;  %700 = vmatpush3.bf16.msra.mxu1 %v785_v28  ;;  %v362_v21 = vrot.slane %v349_v61, %v103_v20 }
  0x43   :  { %701 = vmatprep.subr.bf16.mxu1 %v893_v0 }
  0x45   :  { %251 = vmatpush1.bf16.msra.mxu0 %v768_v22 }
  0x46   :  { %494 = vmatprep.subr.bf16.mxu0 %v772_v25  ;;  %702 = vmatpush3.bf16.msra.mxu1 %v789_v31 }
  0x47   :  { %707 = vmatprep.subr.bf16.mxu1 %v893_v0 }
  0x48   :  { %269 = vmatmul.mubr.bf16.vlgmr.msra.gmra.mrb[0].mxu0 %v56_v26 }
  0x49   :  { %495 = vmatpush1.bf16.msra.mxu0 %v770_v27  ;;  %526 = vmatprep.mubr.bf16.mxu0 %v894_v1  ;;  %v96_v1 = vrot.slane %v91_v62, %v95_v60 }
  0x4a   :  { %496 = vmatprep.subr.bf16.mxu0 %v776_v29  ;;  %704 = vmatmul.mubr.bf16.vlgmr.msra.gmra.mrb[0].mxu1 %v56_v26 }
  0x4b   :  { %708 = vmatpush3.bf16.msra.mxu1 %v796_v34  ;;  %723 = vmatprep.mubr.msk.bf16.mxu1 %vm895_vm0, %v893_v0 }
  0x4c   :  { %709 = vmatprep.subr.bf16.mxu1 %v893_v0 }
  0x4d   :  { %497 = vmatpush1.bf16.msra.mxu0 %v774_v30 }
  0x4e   :  { %498 = vmatprep.subr.bf16.mxu0 %v780_v32 }
  0x4f   :  { %710 = vmatpush3.bf16.msra.mxu1 %v800_v37 }
  0x50   :  { %711 = vmatprep.subr.bf16.mxu1 %v893_v0 }
  0x51   :  { %499 = vmatpush1.bf16.msra.mxu0 %v778_v33 }
  0x52   :  { %500 = vmatprep.subr.bf16.mxu0 %v784_v35 }
  0x53   :  { %712 = vmatpush3.bf16.msra.mxu1 %v801_v40 }
  0x54   :  { %713 = vmatprep.subr.bf16.mxu1 %v893_v0 }
  0x55   :  { %501 = vmatpush1.bf16.msra.mxu0 %v782_v36 }
  0x56   :  { %502 = vmatprep.subr.bf16.mxu0 %v788_v38 }
  0x57   :  { %714 = vmatpush3.bf16.msra.mxu1 %v802_v43 }
  0x58   :  { %715 = vmatprep.subr.bf16.mxu1 %v893_v0 }
  0x59   :  { %503 = vmatpush1.bf16.msra.mxu0 %v786_v39 }
  0x5a   :  { %504 = vmatprep.subr.bf16.mxu0 %v792_v41 }
  0x5b   :  { %716 = vmatpush3.bf16.msra.mxu1 %v803_v46 }
  0x5c   :  { %717 = vmatprep.subr.bf16.mxu1 %v893_v0 }
  0x5d   :  { %505 = vmatpush1.bf16.msra.mxu0 %v790_v42 }
  0x5e   :  { %506 = vmatprep.subr.bf16.mxu0 %v795_v44 }
  0x5f   :  { %718 = vmatpush3.bf16.msra.mxu1 %v804_v50 }
  0x60   :  { %719 = vmatprep.subr.bf16.mxu1 %v893_v0 }
  0x61   :  { %507 = vmatpush1.bf16.msra.mxu0 %v793_v45 }
  0x62   :  { %508 = vmatprep.subr.bf16.mxu0 %v799_v47 }
  0x63   :  { %720 = vmatpush3.bf16.msra.mxu1 %v805_v52 }
  0x64   :  { %721 = vmatprep.subr.bf16.mxu1 %v893_v0  ;;  %v354_v0 = vrot.slane %v349_v61, %v95_v60 }
  0x65   :  { %509 = vmatpush1.bf16.msra.mxu0 %v797_v48 }
  0x66   :  { %v727_v4 = vadd.f32 %v354_v0, %v96_v1 }
  0x67   :  { %722 = vmatpush3.bf16.msra.mxu1 %v806_v53 }
  0x68   :  { %527 = vmatmul.mubr.bf16.vlgmr.msra.gmra.mrb[0].mxu0 %v58_v51 }
  0x6a   :  { %724 = vmatmul.mubr.bf16.vlgmr.msra.gmra.mrb[4].mxu1 %v58_v51 }
 0x11d   :  { %v311_v54 = vpop.f32.mrb[0].mxu1 }
 0x11e   :  { %v705_v55 = vpop.f32.mrb[1].mxu1  ;;  %v312_v27 = vadd.f32 %v311_v54, %v104_v23 }
 0x11f   :  { %v314_v56 = vpop.f32.mrb[2].mxu1 }
 0x120   :  { %v706_v57 = vpop.f32.mrb[3].mxu1 }
 0x13b   :  { %v528_v5 = vpop.f32.mrb[0].mxu0 }
 0x13c   :  { %v728_v7 = vadd.f32 %v727_v4, %v528_v5  ;;  %v530_v8 = vpop.f32.mrb[1].mxu0 }
 0x13d   :  { %v532_v9 = vpop.f32.mrb[2].mxu0  ;;  %v730_v12 = vadd.f32 %v729_v6, %v530_v8  ;;  %v569_v14 = vpop.f32.mrb[4].mxu1 }
 0x13e   :  { %v667_v10 = vmul.f32 -1.442695, %v728_v7  ;;  %v533_v11 = vpop.f32.mrb[3].mxu0  ;;  %v725_v15 = vpop.f32.mrb[5].mxu1  ;;  %v570_v25 = vadd.f32 %v569_v14, %v362_v21 }
 0x13f   :  { %v668_v13 = vmul.f32 -1.442695, %v730_v12  ;;  %v572_v16 = vpop.f32.mrb[6].mxu1 }
 0x140   :  { %807 = vpow2.f32 %v667_v10  ;;  %v726_v17 = vpop.f32.mrb[7].mxu1 }
 0x141   :  { %809 = vpow2.f32 %v668_v13 }
 0x14a   :  { %v808_v18 = vpop.eup %807 }
 0x14b   :  { %v579_v19 = vadd.f32 1.0, %v808_v18  ;;  %v810_v22 = vpop.eup %809 }
 0x14c   :  { %v586_v24 = vadd.f32 1.0, %v810_v22 }
 0x14d   :  { %811 = vrcp.f32 %v579_v19 }
 0x14e   :  { %813 = vrcp.f32 %v586_v24 }
 0x157   :  { %v812_v26 = vpop.eup %811 }
 0x158   :  { %v589_v28 = vmul.f32 %v812_v26, %v570_v25  ;;  %v814_v30 = vpop.eup %813 }
 0x159   :  { %v592_v31 = vsub.f32 1.0, %v814_v30  ;;  %v594_v34 = vmul.f32 %v814_v30, %v986_v49 }
 0x15a   :  { %v590_v29 = vadd.f32 %v589_v28, %v312_v27 }
 0x15c   :  { %815 = vtanh.f32 %v590_v29 }
 0x166   :  { %v816_v32 = vpop.eup %815 }
 0x167   :  { %v593_v33 = vmul.f32 %v816_v32, %v592_v31 }
 0x169   :  { %v595_v35 = vadd.f32 %v594_v34, %v593_v33 }
 0x16b   :  { %596 = vst [vmem:[#allocation7] sm:$0xff] %v595_v35  ;;  %v597_v36 = vpack.c.bf16 %v595_v35, %v595_v35 }
 0x16c   :  { %872 = shalt.err (!%p869_p6)
}
 0x16d   :  { %s873_s11 = scalar_lea.hbm %s1021_s6, 128 }
 0x16e   :  { %p874_p7 = scmp.ne.s32.totalorder %s1021_s6, %s873_s11  ;;  %p877_p8 = scmp.lt.u32.totalorder %s873_s11, %s1021_s6 }
 0x170   :  { %p879_p9 = pnand %p877_p8, %p874_p7 }
 0x172   :  { %882 = shalt.err (!%p879_p9)
}
 0x173   :  { %608 = dma.vmem_to_hbm [thread:$0]  %s606_s5, 128, %s1021_s6, [#allocation4]   ;;  %598 = vst [vmem:[%s1022_s7] sm:$0xf] %v597_v36 }
 0x174   :  { %887 = dma.done.wait [#allocation4], 128  }
 0x175   :  { %888 = vsyncadd [#allocation4], 4294967168 }
 0x176   :  { %616 = vsyncpa [#allocation3], 1 }
 0x177   :  { %617 = vsyncpa [#allocation6], 1 }
 0x178   :  { %618 = vsyncpa [#allocation4], 1 }

</bundles_post_ra>
